<compile_context>
chip_gen: v5e
topology: v5e:2x2
jax: 0.10.0
libtpu: 0.0.40
codegen_flags: <defaults>
</compile_context>

<pallas_src>
import jax
import jax.numpy as jnp
from jax import lax
from jax.experimental import pallas as pl
from jax.experimental.pallas import tpu as pltpu


def _round_up(x, m):
    return ((x + m - 1) // m) * m


def _cdiv(a, b):
    return (a + b - 1) // b


def _choose_tiles(nc, hw):
    """Pick (rows, hw_tile): rows multiple of 8/16 (<=64), hw_tile multiple of 128."""
    nc8 = _round_up(max(nc, 1), 8)
    if nc8 <= 16:
        rows = nc8
    else:
        # <= 64 rows keeps both (rows,128) f32 accumulators vreg-resident, and
        # ceil(nc/2) gives >= 2 row blocks so a 2-TensorCore chip splits the rows.
        rows = min(64, _round_up(_cdiv(nc8, 2), 16))
    # Lane-tile budget: keep the unrolled in-kernel chunk loop to a few thousand
    # vector ops while making each grid step ~0.5-2.5 MiB per stream.
    max_chunks = max(32, min(160, 4096 // rows))
    hw_tile = min(_round_up(max(hw, 1), 128), 128 * max_chunks)
    return rows, hw_tile


def _stream_dtype(dtype, rows):
    """Narrowest lossless, layout-safe dtype to stream this array from HBM."""
    dtype = jnp.dtype(dtype)
    if dtype == jnp.float32:
        return jnp.float32
    if rows % 16 == 0 and (dtype == jnp.bool_ or jnp.issubdtype(dtype, jnp.integer)
                           or dtype == jnp.bfloat16):
        return jnp.bfloat16        # 0/1-valued streams: exact at half the f32 bytes
    return jnp.float32


def _make_dice_kernel(has_mask, rows, hw_tile, hw_total, grid_k, eps):
    need_tail = (hw_total % hw_tile) != 0
    hw_rem = hw_total - (grid_k - 1) * hw_tile      # valid lanes in the last HW block

    def kernel(*refs):
        if has_mask:
            pred_ref, target_ref, mask_ref, out_ref, inter_acc, sum_acc = refs
        else:
            pred_ref, target_ref, out_ref, inter_acc, sum_acc = refs
            mask_ref = None

        k = pl.program_id(1)
        last_k = pl.num_programs(1) - 1

        @pl.when(k == 0)
        def _init():
            inter_acc[...] = jnp.zeros_like(inter_acc)
            sum_acc[...] = jnp.zeros_like(sum_acc)

        def accumulate(valid_lanes):
            # valid_lanes is STATIC: number of in-bounds lanes in this HW block.
            # Local (vreg-resident) partials; a single scratch RMW per grid step.
            inter_l = jnp.zeros((rows, 128), jnp.float32)
            sum_l = jnp.zeros((rows, 128), jnp.float32)
            for c in range(_cdiv(valid_lanes, 128)):
                lo = c * 128
                sl = slice(lo, lo + 128)
                x = pred_ref[:, sl].astype(jnp.float32)
                # sigmoid(x) = 0.5*tanh(0.5*x) + 0.5 : one EUP op, no VPU divide.
                p = 0.5 * jnp.tanh(0.5 * x) + 0.5
                t = target_ref[:, sl].astype(jnp.float32)
                if has_mask:
                    m = mask_ref[:, sl].astype(jnp.float32)
                    p = p * m
                    t = t * m
                rem = valid_lanes - lo
                if rem < 128:
                    # Neutralize the ragged tail lanes (garbage from the OOB block).
                    lane = lax.broadcasted_iota(jnp.int32, (rows, 128), 1)
                    ok = lane < rem
                    p = jnp.where(ok, p, 0.0)
                    t = jnp.where(ok, t, 0.0)
                inter_l = inter_l + p * t
                sum_l = sum_l + (p + t)          # fused psum + tsum accumulator
            inter_acc[...] += inter_l
            sum_acc[...] += sum_l

        if not need_tail:
            accumulate(hw_tile)
        elif grid_k == 1:
            accumulate(hw_rem)
        else:
            @pl.when(k != last_k)
            def _full():
                accumulate(hw_tile)

            @pl.when(k == last_k)
            def _tail():
                accumulate(hw_rem)

        @pl.when(k == last_k)
        def _finalize():
            # One XLU cross-lane reduce per row block, in the final step only.
            inter = jnp.sum(inter_acc[...], axis=1, keepdims=True)             # (rows,1)
            denom = jnp.sum(sum_acc[...], axis=1, keepdims=True) + 2.0 * eps
            row_loss = 1.0 - 2.0 * inter / denom
            out_ref[...] = jnp.broadcast_to(row_loss, (rows, 128))             # lane-dense store

    return kernel


def dice_loss_pallas(pred, target, mask=None, *, eps=1e-6, loss_weight=1.0,
                     pred_bf16=False):
    """DiceLoss.forward(pred, target, mask=mask) with reduction='mean' (default path)."""
    N, C, H, W = pred.shape
    NC, HW = N * C, H * W
    rows, hw_tile = _choose_tiles(NC, HW)
    row_blocks = _cdiv(NC, rows)
    k_blocks = _cdiv(HW, hw_tile)

    # pred stream (logits): keep f32 by default; optionally bf16 (sigmoid stays f32).
    pred2d = pred.reshape(NC, HW)
    if pred_bf16 and rows % 16 == 0 and pred2d.dtype == jnp.float32:
        pred2d = pred2d.astype(jnp.bfloat16)
    elif not (pred2d.dtype == jnp.float32 or
              (pred2d.dtype == jnp.bfloat16 and rows % 16 == 0)):
        pred2d = pred2d.astype(jnp.float32)

    def prep(x):
        x2d = x.reshape(NC, HW)
        dt = _stream_dtype(x2d.dtype, rows)
        return x2d if x2d.dtype == dt else x2d.astype(dt)

    inputs = [pred2d, prep(target)]
    has_mask = mask is not None
    if has_mask:
        inputs.append(prep(mask))

    kernel = _make_dice_kernel(has_mask, rows, hw_tile, HW, k_blocks, float(eps))

    data_spec = pl.BlockSpec((rows, hw_tile), lambda r, k: (r, k))

    # VMEM: double-buffered input tiles + output block + two accumulators + margin.
    vmem_need = sum(2 * rows * hw_tile * x.dtype.itemsize for x in inputs)
    vmem_need += 4 * rows * 128 * 4 + (2 << 20)
    vmem_limit = int(min(48 << 20, max(vmem_need * 3 // 2, 8 << 20)))  # v7x-safe cap

    out = pl.pallas_call(
        kernel,
        out_shape=jax.ShapeDtypeStruct((row_blocks * rows, 128), jnp.float32),
        grid_spec=pltpu.PrefetchScalarGridSpec(
            num_scalar_prefetch=0,
            grid=(row_blocks, k_blocks),
            in_specs=[data_spec] * len(inputs),
            out_specs=pl.BlockSpec((rows, 128), lambda r, k: (r, 0)),
            scratch_shapes=[
                pltpu.VMEM((rows, 128), jnp.float32),   # intersection accumulator
                pltpu.VMEM((rows, 128), jnp.float32),   # sum(p + t) accumulator
            ],
        ),
        compiler_params=pltpu.CompilerParams(
            # rows: parallel (v7x: 2 TCs split row blocks); HW: reduction (last axis).
            dimension_semantics=("parallel", "arbitrary"),
            vmem_limit_bytes=vmem_limit,
        ),
    )(*inputs)

    per_row_loss = out[:NC, 0]          # drop ragged pad rows (never masked in-kernel)
    return loss_weight * jnp.mean(per_row_loss)


def _dice_loss_ref(pred, target, mask=None, *, eps=1e-6, loss_weight=1.0):
    """Pure-JAX reference mirroring the PyTorch module."""
    N, C, H, W = pred.shape
    p = jax.nn.sigmoid(pred.astype(jnp.float32)).reshape(N, C, -1)
    t = target.reshape(N, C, -1).astype(jnp.float32)
    if mask is not None:
        m = mask.reshape(N, C, -1).astype(jnp.float32)
        p = p * m
        t = t * m
    inter = jnp.sum(p * t, axis=2)
    psum = jnp.sum(p, axis=2) + eps
    tsum = jnp.sum(t, axis=2) + eps
    dice = 2.0 * inter / (psum + tsum)
    return loss_weight * jnp.mean(1.0 - dice)


def _check(got, want, rtol, atol, tag):
    got = jax.block_until_ready(got)
    assert jnp.allclose(got, want, rtol=rtol, atol=atol), (tag, got, want)


if __name__ == "__main__":
    key = jax.random.PRNGKey(0)
    k1, k2, k3 = jax.random.split(key, 3)

    # Base shape from the module's forward (N, C, H, W).
    N, C, H, W = 2, 4, 16, 16
    pred = jax.random.normal(k1, (N, C, H, W), dtype=jnp.float32)
    target = (jax.random.uniform(k2, (N, C, H, W)) > 0.5).astype(jnp.float32)
    mask = (jax.random.uniform(k3, (N, C, H, W)) > 0.2).astype(jnp.float32)

    # 1) Default path (mask=None).
    _check(dice_loss_pallas(pred, target),
           _dice_loss_ref(pred, target), 1e-4, 1e-5, "no_mask")

    # 2) Masked path (3-stream kernel).
    _check(dice_loss_pallas(pred, target, mask=mask),
           _dice_loss_ref(pred, target, mask=mask), 1e-4, 1e-5, "mask")

    # 3) Ragged shape handled fully in-kernel (NC=3, HW=130 -> masked tail lanes).
    p2 = jax.random.normal(k1, (1, 3, 10, 13), dtype=jnp.float32)
    t2 = (jax.random.uniform(k2, (1, 3, 10, 13)) > 0.5).astype(jnp.float32)
    m2 = (jax.random.uniform(k3, (1, 3, 10, 13)) > 0.3).astype(jnp.float32)
    _check(dice_loss_pallas(p2, t2),
           _dice_loss_ref(p2, t2), 1e-4, 1e-5, "ragged_no_mask")
    _check(dice_loss_pallas(p2, t2, mask=m2),
           _dice_loss_ref(p2, t2, mask=m2), 1e-4, 1e-5, "ragged_mask")

    # 4) Multi row-block + multi HW-block with ragged tail, bf16 target/mask streams.
    p3 = jax.random.normal(k1, (1, 256, 90, 100), dtype=jnp.float32)
    t3 = (jax.random.uniform(k2, (1, 256, 90, 100)) > 0.5).astype(jnp.bfloat16)
    m3 = (jax.random.uniform(k3, (1, 256, 90, 100)) > 0.2).astype(jnp.bfloat16)
    _check(dice_loss_pallas(p3, t3, mask=m3),
           _dice_loss_ref(p3, t3, mask=m3), 1e-4, 1e-5, "multi_rk_ragged_mask")

    # 5) Multi HW-block reduction that divides exactly (no tail masking path).
    p4 = jax.random.normal(k1, (2, 4, 160, 256), dtype=jnp.float32)
    t4 = (jax.random.uniform(k2, (2, 4, 160, 256)) > 0.5).astype(jnp.float32)
    _check(dice_loss_pallas(p4, t4),
           _dice_loss_ref(p4, t4), 1e-4, 1e-5, "multi_k_exact")

    # 6) Optional bf16 pred stream (approximate; looser tolerance).
    p5 = jax.random.normal(k1, (2, 16, 16, 16), dtype=jnp.float32)
    t5 = (jax.random.uniform(k2, (2, 16, 16, 16)) > 0.5).astype(jnp.float32)
    _check(dice_loss_pallas(p5, t5, pred_bf16=True),
           _dice_loss_ref(p5, t5), 2e-2, 5e-3, "pred_bf16")

    print("KERNEL_OK")
</pallas_src>

<mosaic_0001>
module attributes {stable_mosaic.version = 11 : i64} {
  func.func @kernel(%arg0: i32, %arg1: i32, %arg2: memref<8x256xf32, #tpu.memory_space<vmem>>, %arg3: memref<8x256xf32, #tpu.memory_space<vmem>>, %arg4: memref<8x128xf32, #tpu.memory_space<vmem>>, %arg5: memref<8x128xf32, #tpu.memory_space<vmem>>, %arg6: memref<8x128xf32, #tpu.memory_space<vmem>>) attributes {dimension_semantics = [#tpu.dimension_semantics<parallel>, #tpu.dimension_semantics<arbitrary>], iteration_bounds = array<i64: 1, 1>, scalar_prefetch = 0 : i64, scratch_operands = 2 : i64, tpu.core_type = #tpu.core_type<tc>, window_params = [{transform_indices = @transform_0, window_bounds = array<i64: 8, 256>}, {transform_indices = @transform_1, window_bounds = array<i64: 8, 256>}, {transform_indices = @transform_2, window_bounds = array<i64: 8, 128>}]} {
    %c0_i32 = arith.constant 0 : i32
    %0 = arith.cmpi eq, %arg1, %c0_i32 : i32
    %1 = arith.extui %0 : i1 to i32
    %c0_i32_0 = arith.constant 0 : i32
    %2 = arith.cmpi ne, %1, %c0_i32_0 : i32
    scf.if %2 {
      %cst_24 = arith.constant 0.000000e+00 : f32
      %40 = vector.broadcast %cst_24 : f32 to vector<8x128xf32>
      %c0_25 = arith.constant 0 : index
      %c0_26 = arith.constant 0 : index
      %41 = vector.load %arg5[%c0_25, %c0_26] : memref<8x128xf32, #tpu.memory_space<vmem>>, vector<8x128xf32>
      tpu.vector_store %arg5[%c0_25, %c0_26], %40 {strides = array<i32>} : memref<8x128xf32, #tpu.memory_space<vmem>>, vector<8x128xf32>,
      %cst_27 = arith.constant 0.000000e+00 : f32
      %42 = vector.broadcast %cst_27 : f32 to vector<8x128xf32>
      %c0_28 = arith.constant 0 : index
      %c0_29 = arith.constant 0 : index
      %43 = vector.load %arg6[%c0_28, %c0_29] : memref<8x128xf32, #tpu.memory_space<vmem>>, vector<8x128xf32>
      tpu.vector_store %arg6[%c0_28, %c0_29], %42 {strides = array<i32>} : memref<8x128xf32, #tpu.memory_space<vmem>>, vector<8x128xf32>,
    } else {
    }
    %cst = arith.constant 0.000000e+00 : f32
    %3 = vector.broadcast %cst : f32 to vector<8x128xf32>
    %cst_1 = arith.constant 0.000000e+00 : f32
    %4 = vector.broadcast %cst_1 : f32 to vector<8x128xf32>
    %c0 = arith.constant 0 : index
    %c0_2 = arith.constant 0 : index
    %5 = vector.load %arg2[%c0, %c0_2] : memref<8x256xf32, #tpu.memory_space<vmem>>, vector<8x128xf32>
    %cst_3 = arith.constant 5.000000e-01 : f32
    %6 = vector.broadcast %cst_3 : f32 to vector<8x128xf32>
    %7 = arith.mulf %6, %5 : vector<8x128xf32>
    %8 = math.tanh %7 : vector<8x128xf32>
    %cst_4 = arith.constant 5.000000e-01 : f32
    %9 = vector.broadcast %cst_4 : f32 to vector<8x128xf32>
    %10 = arith.mulf %9, %8 : vector<8x128xf32>
    %cst_5 = arith.constant 5.000000e-01 : f32
    %11 = vector.broadcast %cst_5 : f32 to vector<8x128xf32>
    %12 = arith.addf %10, %11 : vector<8x128xf32>
    %c0_6 = arith.constant 0 : index
    %c0_7 = arith.constant 0 : index
    %13 = vector.load %arg3[%c0_6, %c0_7] : memref<8x256xf32, #tpu.memory_space<vmem>>, vector<8x128xf32>
    %14 = arith.mulf %12, %13 : vector<8x128xf32>
    %15 = arith.addf %3, %14 : vector<8x128xf32>
    %16 = arith.addf %12, %13 : vector<8x128xf32>
    %17 = arith.addf %4, %16 : vector<8x128xf32>
    %c0_8 = arith.constant 0 : index
    %c128 = arith.constant 128 : index
    %18 = vector.load %arg2[%c0_8, %c128] : memref<8x256xf32, #tpu.memory_space<vmem>>, vector<8x128xf32>
    %cst_9 = arith.constant 5.000000e-01 : f32
    %19 = vector.broadcast %cst_9 : f32 to vector<8x128xf32>
    %20 = arith.mulf %19, %18 : vector<8x128xf32>
    %21 = math.tanh %20 : vector<8x128xf32>
    %cst_10 = arith.constant 5.000000e-01 : f32
    %22 = vector.broadcast %cst_10 : f32 to vector<8x128xf32>
    %23 = arith.mulf %22, %21 : vector<8x128xf32>
    %cst_11 = arith.constant 5.000000e-01 : f32
    %24 = vector.broadcast %cst_11 : f32 to vector<8x128xf32>
    %25 = arith.addf %23, %24 : vector<8x128xf32>
    %c0_12 = arith.constant 0 : index
    %c128_13 = arith.constant 128 : index
    %26 = vector.load %arg3[%c0_12, %c128_13] : memref<8x256xf32, #tpu.memory_space<vmem>>, vector<8x128xf32>
    %27 = arith.mulf %25, %26 : vector<8x128xf32>
    %28 = arith.addf %15, %27 : vector<8x128xf32>
    %29 = arith.addf %25, %26 : vector<8x128xf32>
    %30 = arith.addf %17, %29 : vector<8x128xf32>
    %c0_14 = arith.constant 0 : index
    %c0_15 = arith.constant 0 : index
    %31 = vector.load %arg5[%c0_14, %c0_15] : memref<8x128xf32, #tpu.memory_space<vmem>>, vector<8x128xf32>
    %32 = arith.addf %31, %28 : vector<8x128xf32>
    %c0_16 = arith.constant 0 : index
    %c0_17 = arith.constant 0 : index
    %33 = vector.load %arg5[%c0_16, %c0_17] : memref<8x128xf32, #tpu.memory_space<vmem>>, vector<8x128xf32>
    tpu.vector_store %arg5[%c0_16, %c0_17], %32 {strides = array<i32>} : memref<8x128xf32, #tpu.memory_space<vmem>>, vector<8x128xf32>,
    %c0_18 = arith.constant 0 : index
    %c0_19 = arith.constant 0 : index
    %34 = vector.load %arg6[%c0_18, %c0_19] : memref<8x128xf32, #tpu.memory_space<vmem>>, vector<8x128xf32>
    %35 = arith.addf %34, %30 : vector<8x128xf32>
    %c0_20 = arith.constant 0 : index
    %c0_21 = arith.constant 0 : index
    %36 = vector.load %arg6[%c0_20, %c0_21] : memref<8x128xf32, #tpu.memory_space<vmem>>, vector<8x128xf32>
    tpu.vector_store %arg6[%c0_20, %c0_21], %35 {strides = array<i32>} : memref<8x128xf32, #tpu.memory_space<vmem>>, vector<8x128xf32>,
    %c0_i32_22 = arith.constant 0 : i32
    %37 = arith.cmpi eq, %arg1, %c0_i32_22 : i32
    %38 = arith.extui %37 : i1 to i32
    %c0_i32_23 = arith.constant 0 : i32
    %39 = arith.cmpi ne, %38, %c0_i32_23 : i32
    scf.if %39 {
      %c0_24 = arith.constant 0 : index
      %c0_25 = arith.constant 0 : index
      %40 = vector.load %arg5[%c0_24, %c0_25] : memref<8x128xf32, #tpu.memory_space<vmem>>, vector<8x128xf32>
      %cst_26 = arith.constant dense<0.000000e+00> : vector<8xf32>
      %41 = vector.multi_reduction <add>, %40, %cst_26 [1] : vector<8x128xf32> to vector<8xf32>
      %42 = vector.shape_cast %41 : vector<8xf32> to vector<8x1xf32>
      %c0_27 = arith.constant 0 : index
      %c0_28 = arith.constant 0 : index
      %43 = vector.load %arg6[%c0_27, %c0_28] : memref<8x128xf32, #tpu.memory_space<vmem>>, vector<8x128xf32>
      %cst_29 = arith.constant dense<0.000000e+00> : vector<8xf32>
      %44 = vector.multi_reduction <add>, %43, %cst_29 [1] : vector<8x128xf32> to vector<8xf32>
      %45 = vector.shape_cast %44 : vector<8xf32> to vector<8x1xf32>
      %cst_30 = arith.constant 2.000000e-06 : f32
      %46 = vector.broadcast %cst_30 : f32 to vector<8x1xf32>
      %47 = arith.addf %45, %46 : vector<8x1xf32>
      %cst_31 = arith.constant 2.000000e+00 : f32
      %48 = vector.broadcast %cst_31 : f32 to vector<8x1xf32>
      %49 = arith.mulf %48, %42 : vector<8x1xf32>
      %50 = arith.divf %49, %47 : vector<8x1xf32>
      %cst_32 = arith.constant 1.000000e+00 : f32
      %51 = vector.broadcast %cst_32 : f32 to vector<8x1xf32>
      %52 = arith.subf %51, %50 : vector<8x1xf32>
      %53 = vector.shape_cast %52 : vector<8x1xf32> to vector<8x1xf32>
      %54 = vector.broadcast %53 : vector<8x1xf32> to vector<8x128xf32>
      %c0_33 = arith.constant 0 : index
      %c0_34 = arith.constant 0 : index
      %55 = vector.load %arg4[%c0_33, %c0_34] : memref<8x128xf32, #tpu.memory_space<vmem>>, vector<8x128xf32>
      tpu.vector_store %arg4[%c0_33, %c0_34], %54 {strides = array<i32>} : memref<8x128xf32, #tpu.memory_space<vmem>>, vector<8x128xf32>,
    } else {
    }
    return
  }
  func.func @transform_0(%arg0: i32, %arg1: i32) -> (i32, i32) {
    %c0_i32 = arith.constant 0 : i32
    return %arg0, %arg1 : i32, i32
  }
  func.func @transform_1(%arg0: i32, %arg1: i32) -> (i32, i32) {
    %c0_i32 = arith.constant 0 : i32
    return %arg0, %arg1 : i32, i32
  }
  func.func @transform_2(%arg0: i32, %arg1: i32) -> (i32, i32) {
    %c0_i32 = arith.constant 0 : i32
    %c0_i32_0 = arith.constant 0 : i32
    return %arg0, %c0_i32 : i32, i32
  }
}

</mosaic_0001>

<bundles_post_ra>
// kernel: tpu_custom_call.1
= control target key start
LH: loop header
LB: loop body
LE: loop exit
PB: predicated region body
PF: predicated region fallthrough
CT: control target
= control target key end

     0   :  { %7 = vsyncpa [#allocation5], 0  ;;  %s232_s0 = inlined_call_operand.hbm [shape: f32[8,256], index: 0, kind: input, shape index: {}]   ;;  %s233_s1 = inlined_call_operand.hbm [shape: f32[8,256], index: 1, kind: input, shape index: {}]   ;;  %s234_s2 = inlined_call_operand.hbm [shape: f32[8,128], index: 2, kind: output, shape index: {}]  }
   0x1   :  { %8 = vsyncpa [#allocation8], 0 }
   0x2   :  { %9 = vsyncpa [#allocation6], 0  ;;  %s15_s11 = sshll.u32 %s232_s0, 4  ;;  %s205_s12 = smov [#allocation4]   ;;  %s16_s11 = int_to_ptr.hbm [resolvable:$true] %s15_s11 }
   0x3   :  { %s17_s13 = sshll.u32 %s205_s12, 4  ;;  %s26_s16 = sshll.u32 %s233_s1, 4  ;;  %s18_s13 = int_to_ptr.vmem [resolvable:$true] %s17_s13  ;;  %s27_s16 = int_to_ptr.hbm [resolvable:$true] %s26_s16 }
   0x4   :  { %20 = dma.hbm_to_vmem [thread:$0]  %s16_s11, 256, %s18_s13, [#allocation5]  }
   0x5   :  { %s206_s17 = smov [#allocation7]  }
   0x6   :  { %s28_s18 = sshll.u32 %s206_s17, 4  ;;  %s29_s18 = int_to_ptr.vmem [resolvable:$true] %s28_s18 }
   0x7   :  { %31 = dma.hbm_to_vmem [thread:$0]  %s27_s16, 256, %s29_s18, [#allocation8]  }
   0x8   :  { %199 = dma.done.wait [#allocation5], 256  }
   0x9   :  { %200 = vsyncadd [#allocation5], 4294967040 }
   0xa   :  { %201 = dma.done.wait [#allocation8], 256  }
   0xb   :  { %202 = vsyncadd [#allocation8], 4294967040  ;;  %v46_v0 = vld [vmem:[#allocation4] sm:$0xff]  ;;  %v56_v1 = vld [vmem:[#allocation4 + $0x8] sm:$0xff]  ;;  %s207_s0 = smov [#allocation9]   ;;  %s107_s21 = sshll.u32 %s234_s2, 4  ;;  %s108_s21 = int_to_ptr.hbm [resolvable:$true] %s107_s21 }
   0xc   :  { %v47_v2 = vmul.f32 0.5, %v46_v0  ;;  %v57_v3 = vmul.f32 0.5, %v56_v1  ;;  %v51_v7 = vld [vmem:[#allocation7] sm:$0xff]  ;;  %v61_v10 = vld [vmem:[#allocation7 + $0x8] sm:$0xff]  ;;  %s105_s1 = sshll.u32 %s207_s0, 4  ;;  %s106_s1 = int_to_ptr.vmem [resolvable:$true] %s105_s1 }
   0xe   :  { %121 = vtanh.f32 %v47_v2 }
   0xf   :  { %123 = vtanh.f32 %v57_v3 }
  0x14   :  { %v122_v4 = vpop.eup %121 }
  0x15   :  { %v124_v5 = vpop.eup %123  ;;  %v49_v6 = vmul.f32 0.5, %v122_v4 }
  0x16   :  { %v59_v8 = vmul.f32 0.5, %v124_v5 }
  0x17   :  { %v50_v9 = vadd.f32 0.5, %v49_v6 }
  0x18   :  { %v60_v11 = vadd.f32 0.5, %v59_v8 }
  0x19   :  { %v54_v12 = vadd.f32 %v51_v7, %v50_v9  ;;  %v52_v15 = vmul.f32 %v51_v7, %v50_v9 }
  0x1a   :  { %v64_v13 = vadd.f32 %v61_v10, %v60_v11  ;;  %v62_v16 = vmul.f32 %v61_v10, %v60_v11 }
  0x1c   :  { %v65_v14 = vadd.f32 %v64_v13, %v54_v12  ;;  %v63_v17 = vadd.f32 %v62_v16, %v52_v15 }
  0x1e   :  { %79 = vadd.xlane.f32.xlu0 %v65_v14 }
  0x26   :  { %76 = vadd.xlane.f32.xlu0 %v63_v17 }
  0x91   :  { %v80_v18 = vpop.xlane.xlu0 %79 }
  0x92   :  { %v81_v19 = vadd.f32 2e-06, %v80_v18 }
  0x94   :  { %125 = vrcp.f32 %v81_v19  ;;  %v94_v23 = vand.u32 2147483648, %v81_v19  ;;  %v92_v26 = vand.u32 2147483647, %v81_v19  ;;  %vm88_vm1 = vweird.f32 %v81_v19 }
  0x96   :  { %v95_v29 = vor.u32 1.1754944e-38, %v94_v23  ;;  %vm93_vm3 = vcmp.eq.f32.partialorder %v92_v26, 8.507059e+37 }
  0x99   :  { %v77_v24 = vpop.xlane.xlu0 %76 }
  0x9a   :  { %v126_v20 = vpop.eup %125  ;;  %v82_v28 = vmul.f32 2.0, %v77_v24 }
  0x9b   :  { %v84_v21 = vmul.f32 %v126_v20, %v81_v19  ;;  %vm89_vm0 = vweird.f32 %v126_v20 }
  0x9c   :  { %vm90_vm2 = vmor %vm88_vm1, %vm89_vm0 }
  0x9d   :  { %v85_v22 = vsub.f32 1.0, %v84_v21 }
  0x9f   :  { %v86_v25 = vmul.f32 %v126_v20, %v85_v22 }
  0xa1   :  { %v87_v27 = vadd.f32 %v126_v20, %v86_v25 }
  0xa3   :  { %v91_v30 = vsel %vm90_vm2, %v126_v20, %v87_v27 }
  0xa4   :  { %v96_v31 = vsel %vm93_vm3, %v95_v29, %v91_v30 }
  0xa5   :  { %v97_v32 = vmul.f32 %v96_v31, %v82_v28 }
  0xa7   :  { %v98_v33 = vsub.f32 1.0, %v97_v32 }
  0xa9   :  { %99 = vst [vmem:[#allocation9] sm:$0xff] %v98_v33 }
  0xaa   :  { %110 = dma.vmem_to_hbm [thread:$0]  %s106_s1, 128, %s108_s21, [#allocation6]  }
  0xab   :  { %203 = dma.done.wait [#allocation6], 128  }
  0xac   :  { %204 = vsyncadd [#allocation6], 4294967168 }
  0xad   :  { %115 = vsyncpa [#allocation5], 1 }
  0xae   :  { %116 = vsyncpa [#allocation8], 1 }
  0xaf   :  { %117 = vsyncpa [#allocation6], 1 }

</bundles_post_ra>
